<compile_context>
chip_gen: v6e
topology: v6e:2x2x1
jax: 0.10.0
libtpu: 0.0.40
codegen_flags: <defaults>
</compile_context>

<pallas_src>
import jax
import jax.numpy as jnp
from jax.experimental import pallas as pl
from jax.experimental.pallas import tpu as pltpu


# ---------------------------------------------------------------------------
# Tiling policy
# ---------------------------------------------------------------------------
def _choose_tiles(B, D, itemsize):
    min_sub = 8 if itemsize >= 4 else 16  # sublane granularity (f32 vs bf16/…)

    # Feature tile: full-D blocks (always legal; no reduction steps, no mask)
    # when D is small; otherwise the largest multiple of 128 that divides D
    # (lane-dense, unmasked stores, no tail block).  Masked-tail fallback only
    # when D has no multiple-of-128 divisor.
    if D <= 4096:
        td = D
    else:
        td = 0
        for cand in (2048, 1024, 512, 256, 128):
            if D % cand == 0:
                td = cand
                break
        if td == 0:
            td = 1024  # masked-tail fallback (rare)

    # Batch tile: target ~4 MiB input blocks (hides the ~0.35us/step overhead
    # on v7x's 3.2 TB/s HBM), cap at 512 rows.  When the whole batch fits in
    # one block, still split it into >=2 blocks (rounded to the sublane
    # multiple) so both v7x TensorCores get work under the "parallel" axis.
    row_bytes = max(td * itemsize, 1)
    tb_cap = min(512, max(min_sub, (4 * 1024 * 1024) // row_bytes))
    tb_cap = max(min_sub, (tb_cap // min_sub) * min_sub)
    if B > tb_cap:
        tb = tb_cap
    else:
        half = -(-B // 2)                        # cdiv(B, 2)
        tb = -(-half // min_sub) * min_sub       # round up to sublane multiple
        if tb >= B:
            tb = B                               # full-extent block is always legal
    return tb, td


# ---------------------------------------------------------------------------
# Kernels
# ---------------------------------------------------------------------------
def _make_kernel(kind, D, td, needs_mask, approx_recip):
    """kind='direct': y=sigmoid(x), ld=sum log(s*(1-s)); kind='inverse': logit."""

    def kernel(x_ref, y_ref, ld_ref):
        k = pl.program_id(1)               # reduction (feature) axis
        xf = x_ref[...].astype(jnp.float32)

        if kind == "direct":
            # Shared exp: e = exp(-|x|) feeds both the sigmoid and the log-det.
            ax = jnp.abs(xf)
            e = jnp.exp(-ax)                       # 1 EUP exp / elem
            one_plus_e = 1.0 + e
            if approx_recip:
                r = pl.reciprocal(one_plus_e, approx=True)
            else:
                r = 1.0 / one_plus_e               # exact recip (f32 outputs)
            s = jnp.where(xf >= 0.0, r, e * r)     # sigmoid(x); select/mul on VPU
            y_ref[...] = s.astype(y_ref.dtype)
            # log(s*(1-s)) = -|x| - 2*log1p(exp(-|x|))   (no underflow, stable)
            ld = -ax - 2.0 * jnp.log1p(e)
        else:
            # True logit branch: y = log(x/(1-x)), ld = -sum log(x - x^2)
            lx = jnp.log(xf)
            l1mx = jnp.log1p(-xf)                  # stable for x near 1
            y_ref[...] = (lx - l1mx).astype(y_ref.dtype)
            ld = -(lx + l1mx)

        if needs_mask:
            # Tail D-block may extend past the real feature dim: zero its
            # contribution to the reduction.
            col = k * td + jax.lax.broadcasted_iota(jnp.int32, ld.shape, 1)
            ld = jnp.where(col < D, ld, 0.0)

        partial = jnp.sum(ld, axis=-1, keepdims=True)

        # Output block index is constant over k -> ld_ref stays resident in
        # VMEM across the reduction axis (accumulator pattern).
        @pl.when(k == 0)
        def _():
            ld_ref[...] = partial

        @pl.when(k != 0)
        def _():
            ld_ref[...] = ld_ref[...] + partial

    return kernel


# ---------------------------------------------------------------------------
# pallas_call wrapper
# ---------------------------------------------------------------------------
def _run_elementwise_logdet(kind, x, tile_b=None, tile_d=None):
    B, D = x.shape
    itemsize = jnp.dtype(x.dtype).itemsize
    min_sub = 8 if itemsize >= 4 else 16

    tb_auto, td_auto = _choose_tiles(B, D, itemsize)
    if tile_b is None:
        tb = tb_auto
    else:
        tb = min(tile_b, B)
        if tb != B:  # partial batch blocks must respect the sublane multiple
            tb = max(min_sub, (tb // min_sub) * min_sub)
    td = td_auto if tile_d is None else min(tile_d, D)
    needs_mask = (D % td) != 0

    grid = (pl.cdiv(B, tb), pl.cdiv(D, td))
    approx_recip = (kind == "direct") and (x.dtype == jnp.bfloat16)
    kernel = _make_kernel(kind, D, td, needs_mask, approx_recip)

    trans_per_elem = 3 if kind == "direct" else 2
    cost = pl.CostEstimate(
        flops=5 * B * D,
        transcendentals=trans_per_elem * B * D,
        bytes_accessed=2 * B * D * itemsize + 4 * B,  # x in + y out + f32 logdet
    )

    y, ld = pl.pallas_call(
        kernel,
        out_shape=(
            jax.ShapeDtypeStruct((B, D), x.dtype),
            # logdet kept in f32 even for bf16 inputs (tiny tensor, lossy sum otherwise)
            jax.ShapeDtypeStruct((B, 1), jnp.float32),
        ),
        grid_spec=pltpu.PrefetchScalarGridSpec(
            num_scalar_prefetch=0,
            grid=grid,
            in_specs=[pl.BlockSpec((tb, td), lambda i, k: (i, k))],
            out_specs=[
                pl.BlockSpec((tb, td), lambda i, k: (i, k)),
                pl.BlockSpec((tb, 1), lambda i, k: (i, 0)),
            ],
        ),
        compiler_params=pltpu.CompilerParams(
            dimension_semantics=("parallel", "arbitrary"),
            vmem_limit_bytes=48 * 1024 * 1024,
        ),
        cost_estimate=cost,
    )(x)
    return y, ld


# ---------------------------------------------------------------------------
# Module-equivalent wrappers (mirror the PyTorch control flow exactly)
# ---------------------------------------------------------------------------
def sigmoid_forward(inputs, cond_inputs=None, mode="direct"):
    if mode == "direct":
        return _run_elementwise_logdet("direct", inputs)
    else:
        return _run_elementwise_logdet("inverse", inputs)


def logit_forward(inputs, cond_inputs=None, mode="direct"):
    # Faithful to the reference: the string is passed positionally and binds to
    # `cond_inputs`, so the parent's mode is always 'direct' (sigmoid branch).
    if mode == "direct":
        return sigmoid_forward(inputs, "inverse")
    else:
        return sigmoid_forward(inputs, "direct")


# ---------------------------------------------------------------------------
if __name__ == "__main__":
    key = jax.random.PRNGKey(0)
    B, D = 16, 256  # small (batch, features); flows operate on 2-D inputs
    # Values in (0, 1) so both the sigmoid-direct and true-logit branches are finite.
    x = jax.random.uniform(key, (B, D), dtype=jnp.float32,
                           minval=0.05, maxval=0.95)

    # Logit module has no parameters, so nothing to initialize.
    y, logdet = logit_forward(x, mode="direct")
    jax.block_until_ready((y, logdet))

    # Reference check (plain JAX) for the literal semantics (sigmoid-direct).
    s_ref = jax.nn.sigmoid(x)
    ld_ref = jnp.sum(jnp.log(s_ref * (1.0 - s_ref)), axis=-1, keepdims=True)
    assert y.shape == (B, D) and logdet.shape == (B, 1)
    assert jnp.allclose(y, s_ref, atol=1e-5, rtol=1e-5)
    assert jnp.allclose(logdet, ld_ref, atol=1e-3, rtol=1e-5)

    # Exercise the true logit (sigmoid-inverse) kernel once.
    y2, ld2 = sigmoid_forward(x, mode="inverse")
    jax.block_until_ready((y2, ld2))
    assert jnp.allclose(y2, jnp.log(x / (1.0 - x)), atol=1e-5, rtol=1e-5)
    assert jnp.allclose(
        ld2, -jnp.sum(jnp.log(x - x * x), axis=-1, keepdims=True),
        atol=1e-3, rtol=1e-5)

    # Exercise the D-axis accumulator + tail-masking fallback with forced small
    # tiles (grid (2, 2), last D block partial -> masked reduction).
    xm = jax.random.uniform(jax.random.PRNGKey(1), (12, 192), dtype=jnp.float32,
                            minval=0.05, maxval=0.95)
    y3, ld3 = _run_elementwise_logdet("direct", xm, tile_b=8, tile_d=128)
    jax.block_until_ready((y3, ld3))
    s3 = jax.nn.sigmoid(xm)
    ld3_ref = jnp.sum(jnp.log(s3 * (1.0 - s3)), axis=-1, keepdims=True)
    assert jnp.allclose(y3, s3, atol=1e-5, rtol=1e-5)
    assert jnp.allclose(ld3, ld3_ref, atol=1e-3, rtol=1e-5)

    # Exercise the bf16 path (approximate reciprocal for y, f32 logdet).
    xb = x.astype(jnp.bfloat16)
    yb, ldb = logit_forward(xb, mode="direct")
    jax.block_until_ready((yb, ldb))
    xbf = xb.astype(jnp.float32)
    sb = jax.nn.sigmoid(xbf)
    ldb_ref = jnp.sum(jnp.log(sb * (1.0 - sb)), axis=-1, keepdims=True)
    assert yb.dtype == jnp.bfloat16 and ldb.dtype == jnp.float32
    assert jnp.allclose(yb.astype(jnp.float32), sb, atol=2e-2, rtol=2e-2)
    assert jnp.allclose(ldb, ldb_ref, atol=0.5, rtol=1e-2)

    print("KERNEL_OK")
</pallas_src>

<mosaic_0001>
module attributes {stable_mosaic.version = 11 : i64} {
  func.func @kernel(%arg0: i32, %arg1: i32, %arg2: memref<8x256xf32, #tpu.memory_space<vmem>>, %arg3: memref<8x256xf32, #tpu.memory_space<vmem>>, %arg4: memref<8x1xf32, #tpu.memory_space<vmem>>) attributes {dimension_semantics = [#tpu.dimension_semantics<parallel>, #tpu.dimension_semantics<arbitrary>], iteration_bounds = array<i64: 2, 1>, scalar_prefetch = 0 : i64, scratch_operands = 0 : i64, tpu.core_type = #tpu.core_type<tc>, window_params = [{transform_indices = @transform_0, window_bounds = array<i64: 8, 256>}, {transform_indices = @transform_1, window_bounds = array<i64: 8, 256>}, {transform_indices = @transform_2, window_bounds = array<i64: 8, 1>}]} {
    %c0 = arith.constant 0 : index
    %c0_0 = arith.constant 0 : index
    %0 = vector.load %arg2[%c0, %c0_0] : memref<8x256xf32, #tpu.memory_space<vmem>>, vector<8x256xf32>
    %1 = math.absf %0 : vector<8x256xf32>
    %cst = arith.constant 0.000000e+00 : f32
    %2 = vector.broadcast %cst : f32 to vector<8x256xf32>
    %3 = arith.subf %2, %1 : vector<8x256xf32>
    %4 = math.exp %3 : vector<8x256xf32>
    %cst_1 = arith.constant 1.000000e+00 : f32
    %5 = vector.broadcast %cst_1 : f32 to vector<8x256xf32>
    %6 = arith.addf %5, %4 : vector<8x256xf32>
    %cst_2 = arith.constant 1.000000e+00 : f32
    %7 = vector.broadcast %cst_2 : f32 to vector<8x256xf32>
    %8 = arith.divf %7, %6 : vector<8x256xf32>
    %cst_3 = arith.constant 0.000000e+00 : f32
    %9 = vector.broadcast %cst_3 : f32 to vector<8x256xf32>
    %10 = arith.cmpf oge, %0, %9 : vector<8x256xf32>
    %11 = arith.mulf %4, %8 : vector<8x256xf32>
    %12 = arith.select %10, %8, %11 : vector<8x256xi1>, vector<8x256xf32>
    %c0_4 = arith.constant 0 : index
    %c0_5 = arith.constant 0 : index
    %13 = vector.load %arg3[%c0_4, %c0_5] : memref<8x256xf32, #tpu.memory_space<vmem>>, vector<8x256xf32>
    tpu.vector_store %arg3[%c0_4, %c0_5], %12 {strides = array<i32>} : memref<8x256xf32, #tpu.memory_space<vmem>>, vector<8x256xf32>,
    %cst_6 = arith.constant 0.000000e+00 : f32
    %14 = vector.broadcast %cst_6 : f32 to vector<8x256xf32>
    %15 = arith.subf %14, %1 : vector<8x256xf32>
    %16 = math.log1p %4 : vector<8x256xf32>
    %cst_7 = arith.constant 2.000000e+00 : f32
    %17 = vector.broadcast %cst_7 : f32 to vector<8x256xf32>
    %18 = arith.mulf %17, %16 : vector<8x256xf32>
    %19 = arith.subf %15, %18 : vector<8x256xf32>
    %cst_8 = arith.constant dense<0.000000e+00> : vector<8xf32>
    %20 = vector.multi_reduction <add>, %19, %cst_8 [1] : vector<8x256xf32> to vector<8xf32>
    %21 = vector.shape_cast %20 : vector<8xf32> to vector<8x1xf32>
    %c0_i32 = arith.constant 0 : i32
    %22 = arith.cmpi eq, %arg1, %c0_i32 : i32
    %23 = arith.extui %22 : i1 to i32
    %c0_i32_9 = arith.constant 0 : i32
    %24 = arith.cmpi ne, %23, %c0_i32_9 : i32
    scf.if %24 {
      %c0_12 = arith.constant 0 : index
      %c0_13 = arith.constant 0 : index
      %28 = vector.load %arg4[%c0_12, %c0_13] : memref<8x1xf32, #tpu.memory_space<vmem>>, vector<8x1xf32>
      tpu.vector_store %arg4[%c0_12, %c0_13], %21 {strides = array<i32>} : memref<8x1xf32, #tpu.memory_space<vmem>>, vector<8x1xf32>,
    } else {
    }
    %c0_i32_10 = arith.constant 0 : i32
    %25 = arith.cmpi ne, %arg1, %c0_i32_10 : i32
    %26 = arith.extui %25 : i1 to i32
    %c0_i32_11 = arith.constant 0 : i32
    %27 = arith.cmpi ne, %26, %c0_i32_11 : i32
    scf.if %27 {
      %c0_12 = arith.constant 0 : index
      %c0_13 = arith.constant 0 : index
      %28 = vector.load %arg4[%c0_12, %c0_13] : memref<8x1xf32, #tpu.memory_space<vmem>>, vector<8x1xf32>
      %29 = arith.addf %28, %21 : vector<8x1xf32>
      %c0_14 = arith.constant 0 : index
      %c0_15 = arith.constant 0 : index
      %30 = vector.load %arg4[%c0_14, %c0_15] : memref<8x1xf32, #tpu.memory_space<vmem>>, vector<8x1xf32>
      tpu.vector_store %arg4[%c0_14, %c0_15], %29 {strides = array<i32>} : memref<8x1xf32, #tpu.memory_space<vmem>>, vector<8x1xf32>,
    } else {
    }
    return
  }
  func.func @transform_0(%arg0: i32, %arg1: i32) -> (i32, i32) {
    %c0_i32 = arith.constant 0 : i32
    return %arg0, %arg1 : i32, i32
  }
  func.func @transform_1(%arg0: i32, %arg1: i32) -> (i32, i32) {
    %c0_i32 = arith.constant 0 : i32
    return %arg0, %arg1 : i32, i32
  }
  func.func @transform_2(%arg0: i32, %arg1: i32) -> (i32, i32) {
    %c0_i32 = arith.constant 0 : i32
    %c0_i32_0 = arith.constant 0 : i32
    return %arg0, %c0_i32 : i32, i32
  }
}

</mosaic_0001>

<bundles_post_ra>
// kernel: tpu_custom_call.1
= control target key start
LH: loop header
LB: loop body
LE: loop exit
PB: predicated region body
PF: predicated region fallthrough
CT: control target
= control target key end

     0   :  { %8 = vsyncpa [#allocation3], 0  ;;  %s748_s0 = inlined_call_operand.hbm [shape: f32[16,256], index: 0, kind: input, shape index: {}]   ;;  %s749_s1 = inlined_call_operand.hbm [shape: f32[16,256], index: 1, kind: output, shape index: {0}]   ;;  %s750_s2 = inlined_call_operand.vmem [shape: f32[16,1], index: 2, kind: output, shape index: {1}]  }
   0x1   :  { %10 = vsyncpa [#allocation3 + $0x1], 0 }
   0x2   :  { %11 = vsyncpa [#allocation4], 0 }
   0x3   :  { %13 = vsyncpa [#allocation4 + $0x1], 0  ;;  %s605_s9 = smov 0   ;;  %s607_s10 = smov 0  }
   0x4   :  { %s609_s11 = smov 0   ;;  %s611_s12 = smov 0  }
   0x5   :  { %s613_s13 = smov 0   ;;  %s615_s14 = smov 0  }
   0x6 LB: > { %s386_s15 = sadd.s32 4294967295, %s586_s14   ;;  %s387_s16 = sadd.s32 4294967294, %s586_s14   ;;  %s586_s14 = sphi %s615_s14, %s19_s14   ;;  %s582_s13 = sphi %s613_s13, %s762_s13   ;;  %s578_s12 = sphi %s611_s12, %s761_s12   ;;  %s574_s11 = sphi %s609_s11, %s760_s11   ;;  %s570_s10 = sphi %s607_s10, %s759_s10   ;;  %s566_s9 = sphi %s605_s9, %s758_s9  }
   0x7   : > { %s31_s17 = sadd.s32 1, %s582_s13  ;;  %s40_s18 = sadd.s32 1, %s574_s11 }
   0x8   : > { %p33_p0 = scmp.ge.s32.totalorder %s31_s17, 2  ;;  %p47_p1 = scmp.ne.s32.totalorder %s574_s11, %s570_s10 }
   0x9   : > { %p48_p2 = scmp.eq.s32.totalorder %s586_s14, 0  ;;  %p53_p3 = scmp.ne.s32.totalorder %s570_s10, %s566_s9 }
   0xa   : > { %s764_s17 = smov (%p33_p0, %s31_s17), 0  ;;  %p54_p5 = scmp.eq.s32.totalorder %s386_s15, 0 }
   0xb   : > { %p646_p4 = por %p48_p2, %p47_p1  ;;  %s35_s20 = ssub.s32 %s582_s13, %s764_s17 }
   0xc   : > { %p79_p6 = scmp.eq.s32.totalorder %s386_s15, 1  ;;  %p38_p7 = scmp.eq.s32.totalorder %s35_s20, 0 }
   0xd   : > { %p652_p8 = por %p54_p5, %p53_p3  ;;  %p85_p10 = scmp.eq.s32.totalorder %s387_s16, 1 }
   0xe   : > { %p656_p9 = por %p79_p6, %p47_p1  ;;  %p416_p13 = scmp.lt.s32.totalorder %s586_s14, 2 }
   0xf   : > { %s661_s23 = scalar_select %p38_p7, %s574_s11, %s40_s18  }
  0x10   : > { %p663_p11 = por %p85_p10, %p53_p3  ;;  %s131_s25 = sand.u32 1, %s574_s11  }
  0x11   : > { %s390_s26 = sshll.u32 %s131_s25, 4  ;;  %s402_s27 = sshll.u32 %s582_s13, 8 }
  0x12   : > { %s754_s24 = scalar_select %p663_p11, 1, 0 }
  0x13   : > { %s143_s30 = scalar_lea.hbm %s748_s0, %s402_s27  ;;  %s135_s3 = scalar_lea.vmem [#allocation2], %s390_s26 }
  0x14   : > { %s145_s4 = sshll.u32 %s135_s3, 4  ;;  %p676_p0 = pnand %p416_p13, %p646_p4  ;;  %s146_s4 = int_to_ptr.vmem [resolvable:$true] %s145_s4 }
  0x15   : > { %p393_p1 = scmp.ge.s32.totalorder %s586_s14, 1  ;;  %p150_p2 = scmp.lt.s32.totalorder %s586_s14, 3 }
  0x16   : > { %s132_s6 = scalar_lea.sflag [#allocation3], %s131_s25  ;;  %p480_p3 = pneg %p676_p0 }
  0x17   : > { %s491_s7 = scalar_lea.vmem %s146_s4, 256  ;;  %s588_s8 = smov [#allocation2]  }
  0x18   : > { %p492_p5 = scmp.ne.s32.totalorder %s146_s4, %s491_s7  ;;  %s496_s15 = sshll.u32 %s588_s8, 4  ;;  %s497_s15 = int_to_ptr.vmem [resolvable:$false] %s496_s15 }
  0x19   : > { %s498_s16 = scalar_lea.vmem %s497_s15, 512  ;;  %p499_p10 = scmp.lt.s32.totalorder %s146_s4, %s497_s15 }
  0x1a   : > { %p494_p6 = pnand %p492_p5, %p480_p3  ;;  %p500_p12 = scmp.lt.s32.totalorder %s498_s16, %s491_s7 }
  0x1c   : > { %p495_p7 = pneg %p494_p6  ;;  %p501_p4 = por %p500_p12, %p499_p10 }
  0x1e   : > { %p502_p13 = pnand %p501_p4, %p495_p7 }
  0x20   : > { %505 = shalt.err (!%p502_p13)
}
  0x21   : > { %411 = dma.hbm_to_vmem [thread:$0]  (!%p676_p0), %s143_s30, 256, %s146_s4, %s132_s6  }
  0x22   : > { %p151_p11 = pnand %p393_p1, %p150_p2 }
  0x23   : > { %s691_s18 = sand.u32 (!%p151_p11), 1, %s570_s10  }
  0x24   : > { %154 = sbr.rel (%p151_p11) target bundleno = 228 (0xe4), region = 24  ;;  %s394_s19 = sshll.u32 (!%p151_p11), %s691_s18, 4 }
  0x25   : > { %s157_s20 = scalar_lea.sflag (!%p151_p11), [#allocation3], %s691_s18  ;;  %s160_s25 = scalar_lea.vmem (!%p151_p11), [#allocation2], %s394_s19 }
  0x29   : > { %557 = dma.done.wait (%p652_p8), %s157_s20, 256  }
  0x2a   : > { %559 = vsyncadd (%p652_p8), %s157_s20, 4294967040  ;;  %v191_v0 = vld [vmem:[%s160_s25] sm:$0xff]  ;;  %v192_v1 = vld [vmem:[%s160_s25 + $0x8] sm:$0xff]  ;;  %s178_s21 = scalar_lea.vmem [#allocation5], %s394_s19  ;;  %s403_s26 = sshll.u32 %s578_s12, 8 }
  0x2b   : > { %v193_v2 = vand.u32 2147483647, %v191_v0  ;;  %v194_v3 = vand.u32 2147483647, %v192_v1  ;;  %vm207_vm2 = vcmp.ge.f32.partialorder %v191_v0, 0.0  ;;  %vm208_vm3 = vcmp.ge.f32.partialorder %v192_v1, 0.0  ;;  %s273_s30 = scalar_lea.hbm %s749_s1, %s403_s26 }
  0x2c   : > { %s275_s27 = sshll.u32 %s178_s21, 4  ;;  %s255_s3 = scalar_lea.sflag [#allocation4], %s691_s18  ;;  %s276_s27 = int_to_ptr.vmem [resolvable:$true] %s275_s27 }
  0x2d   : > { %v195_v4 = vsub.f32 0.0, %v193_v2  ;;  %v196_v5 = vsub.f32 0.0, %v194_v3  ;;  %s506_s4 = scalar_lea.vmem %s276_s27, 256  ;;  %s589_s5 = smov [#allocation5]  }
  0x2e   : > { %p507_p8 = scmp.ne.s32.totalorder %s276_s27, %s506_s4  ;;  %s510_s6 = sshll.u32 %s589_s5, 4  ;;  %s511_s6 = int_to_ptr.vmem [resolvable:$false] %s510_s6 }
  0x2f   : > { %v197_v6 = vmul.f32 1.442695, %v195_v4  ;;  %v199_v7 = vmul.f32 1.442695, %v196_v5  ;;  %s512_s7 = scalar_lea.vmem %s511_s6, 512  ;;  %p513_p0 = scmp.lt.s32.totalorder %s276_s27, %s511_s6 }
  0x30   : > { %p508_p11 = pnand %p507_p8, %p656_p9  ;;  %p514_p1 = scmp.lt.s32.totalorder %s512_s7, %s506_s4 }
  0x31   : > { %466 = vpow2.f32 %v197_v6 }
  0x32   : > { %468 = vpow2.f32 %v199_v7  ;;  %p509_p12 = pneg %p508_p11  ;;  %p515_p2 = por %p514_p1, %p513_p0 }
  0x34   : > { %p516_p3 = pnand %p515_p2, %p509_p12 }
  0x3e   : > { %v467_v8 = vpop.eup %466 }
  0x3f   : > { %v469_v9 = vpop.eup %468  ;;  %v201_v10 = vadd.f32 1.0, %v467_v8  ;;  %v218_v12 = vmul.f32 -0.5, %v467_v8  ;;  %v221_v15 = vand.u32 2147483647, %v467_v8 }
  0x40   : > { %v202_v11 = vadd.f32 1.0, %v469_v9  ;;  %v227_v13 = vmul.f32 -0.5, %v469_v9  ;;  %v230_v17 = vand.u32 2147483647, %v469_v9 }
  0x41   : > { %470 = vlog2.f32 %v201_v10  ;;  %v219_v14 = vadd.f32 1.0, %v218_v12  ;;  %vm222_vm0 = vcmp.lt.f32.partialorder %v221_v15, 0.0004427343 }
  0x42   : > { %472 = vlog2.f32 %v202_v11  ;;  %v228_v16 = vadd.f32 1.0, %v227_v13  ;;  %vm231_vm1 = vcmp.lt.f32.partialorder %v230_v17, 0.0004427343 }
  0x43   : > { %474 = vrcp.f32 %v201_v10  ;;  %v220_v18 = vmul.f32 %v467_v8, %v219_v14 }
  0x44   : > { %476 = vrcp.f32 %v202_v11  ;;  %v229_v20 = vmul.f32 %v469_v9, %v228_v16 }
  0x4e   : > { %v471_v19 = vpop.eup %470 }
  0x4f   : > { %v473_v21 = vpop.eup %472  ;;  %v217_v22 = vmul.f32 0.6931472, %v471_v19 }
  0x50   : > { %v226_v23 = vmul.f32 0.6931472, %v473_v21  ;;  %v475_v30 = vpop.eup %474 }
  0x51   : > { %v223_v24 = vsel %vm222_vm0, %v220_v18, %v217_v22  ;;  %v477_v31 = vpop.eup %476  ;;  %v209_v33 = vmul.f32 %v475_v30, %v467_v8 }
  0x52   : > { %v232_v25 = vsel %vm231_vm1, %v229_v20, %v226_v23  ;;  %v233_v26 = vmul.f32 2.0, %v223_v24  ;;  %v210_v34 = vmul.f32 %v477_v31, %v469_v9 }
  0x53   : > { %v234_v27 = vmul.f32 2.0, %v232_v25  ;;  %v211_v35 = vsel %vm207_vm2, %v475_v30, %v209_v33 }
  0x54   : > { %v235_v28 = vsub.f32 %v195_v4, %v233_v26  ;;  %v212_v36 = vsel %vm208_vm3, %v477_v31, %v210_v34  ;;  %213 = vst [vmem:[%s178_s21] sm:$0xff] %v211_v35 }
  0x55   : > { %v236_v29 = vsub.f32 %v196_v5, %v234_v27  ;;  %214 = vst [vmem:[%s178_s21 + $0x8] sm:$0xff] %v212_v36 }
  0x57   : > { %v237_v32 = vadd.f32 %v236_v29, %v235_v28 }
  0x59   : > { %238 = vadd.xlane.f32.xlu0 %v237_v32 }
  0x5a   : > { %519 = shalt.err (!%p516_p3)
}
  0x5b   : > { %s520_s8 = scalar_lea.hbm %s273_s30, 256  ;;  %s524_s18 = scalar_lea.hbm %s749_s1, 512 }
  0x5c   : > { %p521_p5 = scmp.ne.s32.totalorder %s273_s30, %s520_s8  ;;  %p525_p10 = scmp.lt.s32.totalorder %s273_s30, %s749_s1 }
  0x5d   : > { %p526_p4 = scmp.lt.s32.totalorder %s524_s18, %s520_s8 }
  0x5e   : > { %p522_p6 = pnand %p521_p5, %p656_p9 }
  0x5f   : > { %p527_p13 = por %p526_p4, %p525_p10 }
  0x60   : > { %p523_p7 = pneg %p522_p6 }
  0x62   : > { %p528_p8 = pnand %p527_p13, %p523_p7 }
  0x64   : > { %531 = shalt.err (!%p528_p8)
}
  0x65   : > { %406 = dma.vmem_to_hbm [thread:$0]  (%p656_p9), %s276_s27, 256, %s273_s30, %s255_s3   ;;  %vm244_vm4 = vcmask 7168  }
  0x66   : > { %p187_p11 = scmp.lt.s32.totalorder %s578_s12, 1 }
  0x68   : > { %s766_s12 = smov (!%p187_p11, %s578_s12), 1 }
  0x69   : > { %s396_s25 = sshll.u32 %s766_s12, 3 }
  0x6a   : > { %s190_s28 = scalar_lea.vmem %s750_s2, %s396_s25 }
  0xe2   : > { %v239_v37 = vpop.xlane.xlu0 %238 }
  0xe3   : > { %245 = vst.msk [vmem:[%s190_s28] sm:$0xff] %vm244_vm4, %v239_v37 }
  0xe4 PF: > { %s290_s29 = sand.u32 1, %s566_s9   ;;  %p756_p12 = scmp.ne.s32.totalorder %s754_s24, 0 }
  0xe5   : > { %p757_p0 = scmp.ge.s32.totalorder %s586_s14, 2  ;;  %s291_s22 = scalar_lea.sflag [#allocation4], %s290_s29 }
  0xe7   : > { %p413_p1 = pnand %p757_p0, %p756_p12 }
  0xe9   : > { %p414_p2 = pneg %p413_p1 }
  0xeb   : > { %561 = dma.done.wait (%p414_p2), %s291_s22, 256  }
  0xec   : > { %563 = vsyncadd (%p414_p2), %s291_s22, 4294967040  ;;  %s19_s14 = sadd.s32 1, %s586_s14   ;;  %s758_s9 = smov %s570_s10 }
  0xed   : > { %p16_p9 = scmp.ge.s32.totalorder %s19_s14, 4   ;;  %s759_s10 = smov %s574_s11 }
  0xee   : > { %s760_s11 = smov %s661_s23  ;;  %s761_s12 = smov %s582_s13 }
  0xef   : > { %s762_s13 = smov %s764_s17  ;;  %18 = sbr.rel (!%p16_p9) target bundleno = 6 (0x6), region = 89 }
  0xf4   :  { %303 = vsyncpa [#allocation3], 1 }
  0xf5   :  { %305 = vsyncpa [#allocation3 + $0x1], 1 }
  0xf6   :  { %306 = vsyncpa [#allocation4], 1 }
  0xf7   :  { %308 = vsyncpa [#allocation4 + $0x1], 1 }

</bundles_post_ra>
